<compile_context>
chip_gen: v7x
topology: tpu7x:2x2x1
jax: 0.10.0
libtpu: 0.0.40
codegen_flags: <defaults>
</compile_context>

<pallas_src>
import jax
import jax.numpy as jnp
from jax import lax
from jax.experimental import pallas as pl
from jax.experimental.pallas import tpu as pltpu  # noqa: F401 (TPU backend)

EPS = 1e-05


def _twisted_policy_kernel(state_ref, optim_ref, action_ref,
                           p1_ref, p2_ref, p3_ref, out_ref):
    B, S = state_ref.shape
    H = p2_ref.shape[1]
    A = p3_ref.shape[1]

    state = state_ref[...]                      # [B, S] f32
    optim = optim_ref[...]                      # [B, 1] f32

    # ---- layer 1 (computed once, shared by pos/neg branches) --------------
    #   [state, o] @ W1 = state @ W1[:S] + o * W1[S]  (+ b1)
    w1s = p1_ref[0:S, :].astype(jnp.bfloat16)   # [S, H]  (static ref slice)
    w1o = p1_ref[S:S + 1, :]                    # [1, H]  f32 (optim column)
    b1 = p1_ref[S + 1:S + 2, :]                 # [1, H]  f32
    base = jnp.dot(state.astype(jnp.bfloat16), w1s,
                   preferred_element_type=jnp.float32) + b1          # [B, H]
    h_pos = jnp.maximum(base + optim * w1o, 0.0)
    h_neg = jnp.maximum(base + (1.0 - optim) * w1o, 0.0)
    h = jnp.concatenate([h_pos, h_neg], axis=0)                      # [2B, H] in vregs

    # ---- layers 2 & 3 run once on the stacked activations ------------------
    h = jnp.maximum(
        jnp.dot(h.astype(jnp.bfloat16), p2_ref[0:H, :].astype(jnp.bfloat16),
                preferred_element_type=jnp.float32) + p2_ref[H:H + 1, :],
        0.0)                                                          # [2B, H]
    logits = jnp.dot(h.astype(jnp.bfloat16), p3_ref[0:H, :].astype(jnp.bfloat16),
                     preferred_element_type=jnp.float32) + p3_ref[H:H + 1, :]  # [2B, A]

    # ---- log-softmax gather via log-sum-exp --------------------------------
    m = jnp.max(logits, axis=1, keepdims=True)                        # [2B, 1]
    lse = m + jnp.log(jnp.sum(jnp.exp(logits - m), axis=1, keepdims=True))

    # one-hot mask built in-kernel from the int32 action indices
    col = lax.broadcasted_iota(jnp.int32, (B, A), 1)
    mask = (col == action_ref[...]).astype(jnp.float32)               # [B, A]

    pos_sel = jnp.sum(logits[0:B, :] * mask, axis=1, keepdims=True)   # [B, 1]
    neg_sel = jnp.sum(logits[B:2 * B, :] * mask, axis=1, keepdims=True)

    pos_log_p = pos_sel - lse[0:B, :]      # == log(gather(softmax(pos_logits)))
    neg_log_p = neg_sel - lse[B:2 * B, :]
    neg_p = jnp.exp(neg_log_p)             # gathered neg probability

    # torch: pos_out + log(1 - exp(log(neg_p + eps)) + eps)
    out_ref[...] = pos_log_p + jnp.log(1.0 - (neg_p + EPS) + EPS)


def _full_spec(shape):
    return pl.BlockSpec(shape, lambda: (0,) * len(shape))


def pack_params(params):
    """One-time packing of the six Linear params into three f32 slabs.

    w1: [S+1, H] (last row = optimality column), b1: [H]
    w2: [H, H],  b2: [H]
    w3: [H, A],  b3: [A]
    Returns (p1 [S+2,H], p2 [H+1,H], p3 [H+1,A]); do this at init / whenever
    params change, NOT per forward call.
    """
    w1, b1, w2, b2, w3, b3 = params
    p1 = jnp.concatenate([w1, b1[None, :]], axis=0).astype(jnp.float32)
    p2 = jnp.concatenate([w2, b2[None, :]], axis=0).astype(jnp.float32)
    p3 = jnp.concatenate([w3, b3[None, :]], axis=0).astype(jnp.float32)
    return p1, p2, p3


def twisted_policy_forward(state, action, optim, packed_params):
    """Replicates RWS_DISCRETE_TWISTED_POLICY.forward.

    state:  [B, S] float32
    action: [B, 1] int32   (indices into the action dimension)
    optim:  [B, 1] float32 (0/1 optimality variable)
    packed_params: output of pack_params()
    returns [B, 1] float32
    """
    p1, p2, p3 = packed_params
    B, _ = state.shape

    operands = (state, optim, action, p1, p2, p3)
    in_specs = [_full_spec(op.shape) for op in operands]

    return pl.pallas_call(
        _twisted_policy_kernel,
        out_shape=jax.ShapeDtypeStruct((B, 1), jnp.float32),
        in_specs=in_specs,
        out_specs=_full_spec((B, 1)),
    )(*operands)


def init_params(key, state_size, actions, hidden_layer):
    """Deterministic init mimicking torch.nn.Linear's U(-1/sqrt(fan_in), ...).
    Weights stored as [in, out]."""
    ks = jax.random.split(key, 6)
    in1 = state_size + 1

    def lin(kw, kb, fan_in, fan_out):
        bound = 1.0 / jnp.sqrt(fan_in)
        w = jax.random.uniform(kw, (fan_in, fan_out), jnp.float32, -bound, bound)
        b = jax.random.uniform(kb, (fan_out,), jnp.float32, -bound, bound)
        return w, b

    w1, b1 = lin(ks[0], ks[1], in1, hidden_layer)
    w2, b2 = lin(ks[2], ks[3], hidden_layer, hidden_layer)
    w3, b3 = lin(ks[4], ks[5], hidden_layer, actions)
    return (w1, b1, w2, b2, w3, b3)


def ref_fwd(state, action, optim, params):
    """Pure-JAX reference following the torch forward structure exactly."""
    w1, b1, w2, b2, w3, b3 = params

    def mlp(x):
        h = jnp.maximum(x @ w1 + b1, 0.0)
        h = jnp.maximum(h @ w2 + b2, 0.0)
        return jax.nn.softmax(h @ w3 + b3, axis=1)

    xp = jnp.concatenate([state, optim], 1)
    xn = jnp.concatenate([state, 1.0 - optim], 1)
    pg = jnp.take_along_axis(mlp(xp), action, axis=1)
    ng = jnp.take_along_axis(mlp(xn), action, axis=1)
    pos_out = jnp.log(pg)
    neg_out = jnp.log(ng + EPS)
    return pos_out + jnp.log(1.0 - jnp.exp(neg_out) + EPS)


if __name__ == "__main__":
    key = jax.random.PRNGKey(0)
    k_state, k_optim, k_action, k_params = jax.random.split(key, 4)

    B = 8            # batch of (state, action, optimality) samples
    STATE_SIZE = 4
    ACTIONS = 4
    HIDDEN = 32

    state = jax.random.normal(k_state, (B, STATE_SIZE), dtype=jnp.float32)
    optim = jax.random.bernoulli(k_optim, 0.5, (B, 1)).astype(jnp.float32)
    action = jax.random.randint(k_action, (B, 1), 0, ACTIONS, dtype=jnp.int32)

    params = init_params(k_params, STATE_SIZE, ACTIONS, HIDDEN)
    packed = pack_params(params)     # one-time, hoisted out of the forward

    out = twisted_policy_forward(state, action, optim, packed)
    out = jax.block_until_ready(out)

    ref = ref_fwd(state, action, optim, params)

    assert out.shape == (B, 1)
    assert bool(jnp.all(jnp.isfinite(out)))
    # Tolerance absorbs precision differences only: the kernel uses bf16 MXU
    # operands (f32 accumulation), a shared-layer-1 + batch-stacked operand
    # ordering, and an LSE gather, while the reference follows the torch op
    # order at default precision.  These differ at the ~1e-2 level at most;
    # real structural bugs (wrong gather / branch / activation) differ by >>0.1.
    assert jnp.allclose(out, ref, atol=2e-2, rtol=2e-2), (out, ref)

    print("KERNEL_OK")
</pallas_src>

<mosaic_0001>
module attributes {stable_mosaic.version = 11 : i64} {
  func.func @_twisted_policy_kernel(%arg0: memref<8x4xf32, #tpu.memory_space<vmem>>, %arg1: memref<8x1xf32, #tpu.memory_space<vmem>>, %arg2: memref<8x1xi32, #tpu.memory_space<vmem>>, %arg3: memref<6x32xf32, #tpu.memory_space<vmem>>, %arg4: memref<33x32xf32, #tpu.memory_space<vmem>>, %arg5: memref<33x4xf32, #tpu.memory_space<vmem>>, %arg6: memref<8x1xf32, #tpu.memory_space<vmem>>) attributes {dimension_semantics = [], scalar_prefetch = 0 : i64, scratch_operands = 0 : i64, tpu.core_type = #tpu.core_type<tc>} {
    %c0 = arith.constant 0 : index
    %c0_0 = arith.constant 0 : index
    %0 = vector.load %arg0[%c0, %c0_0] : memref<8x4xf32, #tpu.memory_space<vmem>>, vector<8x4xf32>
    %c0_1 = arith.constant 0 : index
    %c0_2 = arith.constant 0 : index
    %1 = vector.load %arg1[%c0_1, %c0_2] : memref<8x1xf32, #tpu.memory_space<vmem>>, vector<8x1xf32>
    %c0_3 = arith.constant 0 : index
    %c0_4 = arith.constant 0 : index
    %2 = vector.load %arg3[%c0_3, %c0_4] : memref<6x32xf32, #tpu.memory_space<vmem>>, vector<4x32xf32>
    %3 = arith.truncf %2 : vector<4x32xf32> to vector<4x32xbf16>
    %c4 = arith.constant 4 : index
    %c0_5 = arith.constant 0 : index
    %4 = vector.load %arg3[%c4, %c0_5] : memref<6x32xf32, #tpu.memory_space<vmem>>, vector<1x32xf32>
    %c5 = arith.constant 5 : index
    %c0_6 = arith.constant 0 : index
    %5 = vector.load %arg3[%c5, %c0_6] : memref<6x32xf32, #tpu.memory_space<vmem>>, vector<1x32xf32>
    %6 = arith.truncf %0 : vector<8x4xf32> to vector<8x4xbf16>
    %cst = arith.constant dense<0.000000e+00> : vector<8x32xf32>
    %7 = tpu.matmul %6, %3, %cst {dimension_numbers = #tpu.dot_dimension_numbers<[1], [0], [0], [1], [0, 0, 1, 1], [], []>} : vector<8x4xbf16>, vector<4x32xbf16>, vector<8x32xf32> -> vector<8x32xf32>
    %8 = vector.broadcast %5 : vector<1x32xf32> to vector<8x32xf32>
    %9 = arith.addf %7, %8 : vector<8x32xf32>
    %10 = vector.broadcast %1 : vector<8x1xf32> to vector<8x32xf32>
    %11 = vector.broadcast %4 : vector<1x32xf32> to vector<8x32xf32>
    %12 = arith.mulf %10, %11 : vector<8x32xf32>
    %13 = arith.addf %9, %12 : vector<8x32xf32>
    %cst_7 = arith.constant 0.000000e+00 : f32
    %14 = vector.broadcast %cst_7 : f32 to vector<8x32xf32>
    %15 = arith.maximumf %13, %14 : vector<8x32xf32>
    %cst_8 = arith.constant 1.000000e+00 : f32
    %16 = vector.broadcast %cst_8 : f32 to vector<8x1xf32>
    %17 = arith.subf %16, %1 : vector<8x1xf32>
    %18 = vector.broadcast %17 : vector<8x1xf32> to vector<8x32xf32>
    %19 = vector.broadcast %4 : vector<1x32xf32> to vector<8x32xf32>
    %20 = arith.mulf %18, %19 : vector<8x32xf32>
    %21 = arith.addf %9, %20 : vector<8x32xf32>
    %cst_9 = arith.constant 0.000000e+00 : f32
    %22 = vector.broadcast %cst_9 : f32 to vector<8x32xf32>
    %23 = arith.maximumf %21, %22 : vector<8x32xf32>
    %24 = tpu.concatenate %15, %23 in 0 : vector<8x32xf32>, vector<8x32xf32> -> vector<16x32xf32>
    %25 = arith.truncf %24 : vector<16x32xf32> to vector<16x32xbf16>
    %c0_10 = arith.constant 0 : index
    %c0_11 = arith.constant 0 : index
    %26 = vector.load %arg4[%c0_10, %c0_11] : memref<33x32xf32, #tpu.memory_space<vmem>>, vector<32x32xf32>
    %27 = arith.truncf %26 : vector<32x32xf32> to vector<32x32xbf16>
    %cst_12 = arith.constant dense<0.000000e+00> : vector<16x32xf32>
    %28 = tpu.matmul %25, %27, %cst_12 {dimension_numbers = #tpu.dot_dimension_numbers<[1], [0], [0], [1], [0, 0, 1, 1], [], []>} : vector<16x32xbf16>, vector<32x32xbf16>, vector<16x32xf32> -> vector<16x32xf32>
    %c32 = arith.constant 32 : index
    %c0_13 = arith.constant 0 : index
    %29 = vector.load %arg4[%c32, %c0_13] : memref<33x32xf32, #tpu.memory_space<vmem>>, vector<1x32xf32>
    %30 = vector.broadcast %29 : vector<1x32xf32> to vector<16x32xf32>
    %31 = arith.addf %28, %30 : vector<16x32xf32>
    %cst_14 = arith.constant 0.000000e+00 : f32
    %32 = vector.broadcast %cst_14 : f32 to vector<16x32xf32>
    %33 = arith.maximumf %31, %32 : vector<16x32xf32>
    %34 = arith.truncf %33 : vector<16x32xf32> to vector<16x32xbf16>
    %c0_15 = arith.constant 0 : index
    %c0_16 = arith.constant 0 : index
    %35 = vector.load %arg5[%c0_15, %c0_16] : memref<33x4xf32, #tpu.memory_space<vmem>>, vector<32x4xf32>
    %36 = arith.truncf %35 : vector<32x4xf32> to vector<32x4xbf16>
    %cst_17 = arith.constant dense<0.000000e+00> : vector<16x4xf32>
    %37 = tpu.matmul %34, %36, %cst_17 {dimension_numbers = #tpu.dot_dimension_numbers<[1], [0], [0], [1], [0, 0, 1, 1], [], []>} : vector<16x32xbf16>, vector<32x4xbf16>, vector<16x4xf32> -> vector<16x4xf32>
    %c32_18 = arith.constant 32 : index
    %c0_19 = arith.constant 0 : index
    %38 = vector.load %arg5[%c32_18, %c0_19] : memref<33x4xf32, #tpu.memory_space<vmem>>, vector<1x4xf32>
    %39 = vector.broadcast %38 : vector<1x4xf32> to vector<16x4xf32>
    %40 = arith.addf %37, %39 : vector<16x4xf32>
    %cst_20 = arith.constant dense<0xFF800000> : vector<16xf32>
    %41 = vector.multi_reduction <maximumf>, %40, %cst_20 [1] : vector<16x4xf32> to vector<16xf32>
    %42 = vector.shape_cast %41 : vector<16xf32> to vector<16x1xf32>
    %43 = vector.broadcast %42 : vector<16x1xf32> to vector<16x4xf32>
    %44 = arith.subf %40, %43 : vector<16x4xf32>
    %45 = math.exp %44 : vector<16x4xf32>
    %cst_21 = arith.constant dense<0.000000e+00> : vector<16xf32>
    %46 = vector.multi_reduction <add>, %45, %cst_21 [1] : vector<16x4xf32> to vector<16xf32>
    %47 = vector.shape_cast %46 : vector<16xf32> to vector<16x1xf32>
    %48 = math.log %47 : vector<16x1xf32>
    %49 = arith.addf %42, %48 : vector<16x1xf32>
    %50 = tpu.iota {dimensions = array<i32: 1>} : vector<8x4xi32>
    %c0_22 = arith.constant 0 : index
    %c0_23 = arith.constant 0 : index
    %51 = vector.load %arg2[%c0_22, %c0_23] : memref<8x1xi32, #tpu.memory_space<vmem>>, vector<8x1xi32>
    %52 = vector.broadcast %51 : vector<8x1xi32> to vector<8x4xi32>
    %53 = arith.cmpi eq, %50, %52 : vector<8x4xi32>
    %54 = arith.extui %53 : vector<8x4xi1> to vector<8x4xi32>
    %55 = arith.sitofp %54 : vector<8x4xi32> to vector<8x4xf32>
    %56 = vector.extract_strided_slice %40 {offsets = [0, 0], sizes = [8, 4], strides = [1, 1]} : vector<16x4xf32> to vector<8x4xf32>
    %57 = arith.mulf %56, %55 : vector<8x4xf32>
    %cst_24 = arith.constant dense<0.000000e+00> : vector<8xf32>
    %58 = vector.multi_reduction <add>, %57, %cst_24 [1] : vector<8x4xf32> to vector<8xf32>
    %59 = vector.shape_cast %58 : vector<8xf32> to vector<8x1xf32>
    %60 = vector.extract_strided_slice %40 {offsets = [8, 0], sizes = [8, 4], strides = [1, 1]} : vector<16x4xf32> to vector<8x4xf32>
    %61 = arith.mulf %60, %55 : vector<8x4xf32>
    %cst_25 = arith.constant dense<0.000000e+00> : vector<8xf32>
    %62 = vector.multi_reduction <add>, %61, %cst_25 [1] : vector<8x4xf32> to vector<8xf32>
    %63 = vector.shape_cast %62 : vector<8xf32> to vector<8x1xf32>
    %64 = vector.extract_strided_slice %49 {offsets = [0, 0], sizes = [8, 1], strides = [1, 1]} : vector<16x1xf32> to vector<8x1xf32>
    %65 = arith.subf %59, %64 : vector<8x1xf32>
    %66 = vector.extract_strided_slice %49 {offsets = [8, 0], sizes = [8, 1], strides = [1, 1]} : vector<16x1xf32> to vector<8x1xf32>
    %67 = arith.subf %63, %66 : vector<8x1xf32>
    %68 = math.exp %67 : vector<8x1xf32>
    %cst_26 = arith.constant 9.99999974E-6 : f32
    %69 = vector.broadcast %cst_26 : f32 to vector<8x1xf32>
    %70 = arith.addf %68, %69 : vector<8x1xf32>
    %cst_27 = arith.constant 1.000000e+00 : f32
    %71 = vector.broadcast %cst_27 : f32 to vector<8x1xf32>
    %72 = arith.subf %71, %70 : vector<8x1xf32>
    %cst_28 = arith.constant 9.99999974E-6 : f32
    %73 = vector.broadcast %cst_28 : f32 to vector<8x1xf32>
    %74 = arith.addf %72, %73 : vector<8x1xf32>
    %75 = math.log %74 : vector<8x1xf32>
    %76 = arith.addf %65, %75 : vector<8x1xf32>
    %c0_29 = arith.constant 0 : index
    %c0_30 = arith.constant 0 : index
    %77 = vector.load %arg6[%c0_29, %c0_30] : memref<8x1xf32, #tpu.memory_space<vmem>>, vector<8x1xf32>
    tpu.vector_store %arg6[%c0_29, %c0_30], %76 {strides = array<i32>} : memref<8x1xf32, #tpu.memory_space<vmem>>, vector<8x1xf32>,
    return
  }
}

</mosaic_0001>

<bundles_post_ra>
// kernel: tpu_custom_call.1
= control target key start
LH: loop header
LB: loop body
LE: loop exit
PB: predicated region body
PF: predicated region fallthrough
CT: control target
= control target key end

     0   :  { %v330_v0 = vmov 0.0   ;;  %vm39_vm0 = vcmask 1041408   ;;  %vm331_vm1 = vmmov 0   ;;  %v332_v5 = vmov 0   ;;  %s440_s3 = inlined_call_operand.vmem [shape: f32[6,32], index: 3, kind: input, shape index: {}]   ;;  %s441_s0 = inlined_call_operand.vmem [shape: f32[8,4], index: 0, kind: input, shape index: {}]   ;;  %s442_s1 = inlined_call_operand.vmem [shape: f32[8,1], index: 1, kind: input, shape index: {}]   ;;  %s443_s2 = inlined_call_operand.vmem [shape: s32[8,1], index: 2, kind: input, shape index: {}]   ;;  %s444_s4 = inlined_call_operand.vmem [shape: f32[33,32], index: 4, kind: input, shape index: {}]   ;;  %s445_s5 = inlined_call_operand.vmem [shape: f32[33,4], index: 5, kind: input, shape index: {}]   ;;  %s446_s6 = inlined_call_operand.vmem [shape: f32[8,1], index: 6, kind: output, shape index: {}]  }
   0x1   :  { %292 = vmatprep.subr.bf16.mxu0 %v330_v0  ;;  %v26_v1 = vld [vmem:[%s440_s3] sm:$0xf]  ;;  %294 = vmatprep.mubr.msk.bf16.mxu0 %vm331_vm1, %v330_v0  ;;  %vm35_vm2 = vcmask 31744   ;;  %v106_v11 = vld [vmem:[%s444_s4 + $0x8] sm:$0xff]  ;;  %v107_v13 = vld [vmem:[%s444_s4 + $0x10] sm:$0xff]  ;;  %vm116_vm3 = vcmask 261120   ;;  %v243_v48 = vlaneseq }
   0x2   :  { %v24_v2 = vld [vmem:[%s441_s0] sm:$0xff]  ;;  %v27_v4 = vpack.c.bf16 %v26_v1, %v26_v1  ;;  %317 = vset.pattern.permute.xlu0 %v332_v5  ;;  %298 = vmatprep.subr.bf16.mxu1 %v330_v0  ;;  %v108_v14 = vld [vmem:[%s444_s4 + $0x18] sm:$0xff]  ;;  %v165_v33 = vld [vmem:[%s445_s5 + $0x8] sm:$0xff]  ;;  %vm270_vm5 = vcmask 7168  }
   0x3   :  { %v25_v3 = vld [vmem:[%s442_s1] sm:$0xff]  ;;  %302 = vmatprep.mubr.msk.bf16.mxu1 %vm331_vm1, %v330_v0  ;;  %v30_v8 = vpack.c.bf16 %v24_v2, %v24_v2  ;;  %v110_v15 = vpack.c.bf16 %v108_v14, %v107_v13  ;;  %v166_v35 = vld [vmem:[%s445_s5 + $0x10] sm:$0xff]  ;;  %v167_v36 = vld [vmem:[%s445_s5 + $0x18] sm:$0xff]  ;;  %v244_v49 = vand.u32 127, %v243_v48 }
   0x4   :  { %85 = vperm.xlu0 %317, %v25_v3   ;;  %v95_v6 = vsub.f32 1.0, %v25_v3  ;;  %v41_v7 = vsel %vm39_vm0, %v27_v4, 0  ;;  %v245_v9 = vld [vmem:[%s443_s2] sm:$0xff]  ;;  %v169_v37 = vpack.c.bf16 %v167_v36, %v166_v35 }
   0x5   :  { %293 = vmatpush3.bf16.msra.mxu0 %v41_v7  ;;  %v105_v10 = vld [vmem:[%s444_s4] sm:$0xff] }
   0x6   :  { %306 = vmatprep.subr.bf16.mxu0 %v330_v0  ;;  %v109_v12 = vpack.c.bf16 %v106_v11, %v105_v10  ;;  %v278_v17 = vld [vmem:[%s440_s3 + $0x4] ss:$0 sm:$0xff]  ;;  %v276_v18 = vld [vmem:[%s440_s3 + $0x5] ss:$0 sm:$0xff]  ;;  %v279_v38 = vld [vmem:[%s444_s4 + $0x20] ss:$0 sm:$0xff] }
   0x7   :  { %v164_v32 = vld [vmem:[%s445_s5] sm:$0xff] }
   0x8   :  { %98 = vperm.xlu0 %317, %v95_v6   ;;  %295 = vmatmul.mubr.msk.bf16.vlgmr.msra.gmra.mrb[0].mxu0 %vm35_vm2, %v30_v8  ;;  %v168_v34 = vpack.c.bf16 %v165_v33, %v164_v32  ;;  %v281_v51 = vld [vmem:[%s445_s5 + $0x20] ss:$0 sm:$0xff] }
   0x9   :  { %310 = vmatprep.mubr.msk.bf16.mxu0 %vm331_vm1, %v330_v0  ;;  %299 = vmatpush3.bf16.msra.mxu1 %v109_v12 }
   0xa   :  { %300 = vmatprep.subr.bf16.mxu1 %v330_v0  ;;  %307 = vmatpush3.bf16.msra.mxu0 %v168_v34 }
   0xb   :  { %308 = vmatprep.subr.bf16.mxu0 %v330_v0 }
   0xc   :  { %247 = vperm.xlu0 %317, %v245_v9  }
   0xd   :  { %301 = vmatpush3.bf16.msra.mxu1 %v110_v15 }
   0xe   :  { %309 = vmatpush3.bf16.msra.mxu0 %v169_v37 }
  0x83   :  { %v86_v16 = vpop.permute.xlu0 %85 }
  0x84   :  { %v92_v21 = vmul.f32 %v278_v17, %v86_v16 }
  0x87   :  { %v99_v19 = vpop.permute.xlu0 %98 }
  0x88   :  { %v101_v22 = vmul.f32 %v278_v17, %v99_v19 }
  0x8b   :  { %v248_v50 = vpop.permute.xlu0 %247 }
  0x8c   :  { %vm249_vm4 = vcmp.eq.s32.totalorder %v244_v49, %v248_v50 }
  0x8d   :  { %v283_v58 = vsel %vm249_vm4, 1.0, %v330_v0 }
  0xdb   :  { %v77_v20 = vpop.f32.mrb[0].mxu0 }
  0xdc   :  { %v78_v23 = vadd.f32 %v276_v18, %v77_v20  ;;  %v296_v24 = vpop.f32.mrb[1].mxu0 }
  0xdd   :  { %v80_v25 = vpop.f32.mrb[2].mxu0 }
  0xde   :  { %v93_v26 = vadd.f32 %v92_v21, %v78_v23  ;;  %v102_v27 = vadd.f32 %v101_v22, %v78_v23  ;;  %v297_v28 = vpop.f32.mrb[3].mxu0 }
  0xe0   :  { %v94_v29 = vmax.f32 %v93_v26, 0.0  ;;  %v103_v30 = vmax.f32 %v102_v27, 0.0 }
  0xe2   :  { %v104_v31 = vpack.c.bf16 %v103_v30, %v94_v29 }
  0xe4   :  { %303 = vmatmul.mubr.msk.bf16.vlgmr.msra.gmra.mrb[0].mxu1 %vm116_vm3, %v104_v31 }
 0x1b7   :  { %v154_v39 = vpop.f32.mrb[0].mxu1 }
 0x1b8   :  { %v155_v40 = vadd.f32 %v279_v38, %v154_v39  ;;  %v304_v41 = vpop.f32.mrb[1].mxu1 }
 0x1b9   :  { %v157_v42 = vpop.f32.mrb[2].mxu1 }
 0x1ba   :  { %v158_v43 = vadd.f32 %v279_v38, %v157_v42  ;;  %v305_v44 = vpop.f32.mrb[3].mxu1  ;;  %v161_v45 = vmax.f32 %v155_v40, 0.0 }
 0x1bc   :  { %v162_v46 = vmax.f32 %v158_v43, 0.0 }
 0x1be   :  { %v163_v47 = vpack.c.bf16 %v162_v46, %v161_v45 }
 0x1c0   :  { %311 = vmatmul.mubr.msk.bf16.vlgmr.msra.gmra.mrb[4].mxu0 %vm116_vm3, %v163_v47 }
 0x293   :  { %v212_v52 = vpop.f32.mrb[4].mxu0 }
 0x294   :  { %v213_v53 = vadd.f32 %v281_v51, %v212_v52  ;;  %v312_v54 = vpop.f32.mrb[5].mxu0 }
 0x295   :  { %v215_v55 = vpop.f32.mrb[6].mxu0 }
 0x296   :  { %v216_v56 = vadd.f32 %v281_v51, %v215_v55  ;;  %v313_v57 = vpop.f32.mrb[7].mxu0  ;;  %v219_v62 = vsel %vm35_vm2, %v213_v53, -inf  ;;  %v252_v9 = vmul.f32 %v283_v58, %v213_v53 }
 0x298   :  { %v222_v59 = vsel %vm35_vm2, %v216_v56, -inf  ;;  %v256_v60 = vmul.f32 %v283_v58, %v216_v56  ;;  %v253_v10 = vsel %vm35_vm2, %v252_v9, 0.0 }
 0x299   :  { %223 = vmax.xlane.f32.xlu1 %v222_v59 }
 0x29a   :  { %v257_v61 = vsel %vm35_vm2, %v256_v60, 0.0 }
 0x29b   :  { %258 = vadd.xlane.f32.xlu0 %v257_v61 }
 0x29d   :  { %220 = vmax.xlane.f32.xlu1 %v219_v62 }
 0x326   :  { %v224_v63 = vpop.xlane.xlu1 %223 }
 0x327   :  { %v226_v1 = vsub.f32 %v216_v56, %v224_v63 }
 0x328   :  { %v259_v15 = vpop.xlane.xlu0 %258 }
 0x329   :  { %v229_v2 = vmul.f32 1.442695, %v226_v1 }
 0x32a   :  { %v221_v3 = vpop.xlane.xlu1 %220 }
 0x32b   :  { %318 = vpow2.f32 %v229_v2  ;;  %v225_v4 = vsub.f32 %v213_v53, %v221_v3 }
 0x32d   :  { %v227_v5 = vmul.f32 1.442695, %v225_v4 }
 0x32f   :  { %320 = vpow2.f32 %v227_v5 }
 0x335   :  { %v319_v6 = vpop.eup %318 }
 0x336   :  { %v234_v0 = vsel %vm35_vm2, %v319_v6, 0.0 }
 0x337   :  { %235 = vadd.xlane.f32.xlu1 %v234_v0 }
 0x339   :  { %v321_v7 = vpop.eup %320 }
 0x33a   :  { %v231_v8 = vsel %vm35_vm2, %v321_v7, 0.0 }
 0x33b   :  { %232 = vadd.xlane.f32.xlu1 %v231_v8 }
 0x33f   :  { %254 = vadd.xlane.f32.xlu1 %v253_v10 }
 0x3c4   :  { %v236_v11 = vpop.xlane.xlu1 %235 }
 0x3c5   :  { %322 = vlog2.f32 %v236_v11 }
 0x3c8   :  { %v233_v18 = vpop.xlane.xlu1 %232 }
 0x3cc   :  { %v255_v27 = vpop.xlane.xlu1 %254 }
 0x3cf   :  { %v323_v12 = vpop.eup %322 }
 0x3d0   :  { %v240_v13 = vmul.f32 0.6931472, %v323_v12 }
 0x3d2   :  { %v242_v14 = vadd.f32 %v240_v13, %v224_v63 }
 0x3d4   :  { %v261_v16 = vsub.f32 %v259_v15, %v242_v14 }
 0x3d6   :  { %v262_v17 = vmul.f32 1.442695, %v261_v16 }
 0x3d8   :  { %324 = vpow2.f32 %v262_v17 }
 0x3d9   :  { %326 = vlog2.f32 %v233_v18 }
 0x3e2   :  { %v325_v19 = vpop.eup %324 }
 0x3e3   :  { %v264_v20 = vadd.f32 1e-05, %v325_v19  ;;  %v327_v23 = vpop.eup %326 }
 0x3e4   :  { %v238_v24 = vmul.f32 0.6931472, %v327_v23 }
 0x3e5   :  { %v265_v21 = vsub.f32 1.0, %v264_v20 }
 0x3e6   :  { %v241_v25 = vadd.f32 %v238_v24, %v221_v3 }
 0x3e7   :  { %v266_v22 = vadd.f32 1e-05, %v265_v21 }
 0x3e8   :  { %v260_v29 = vsub.f32 %v255_v27, %v241_v25 }
 0x3e9   :  { %328 = vlog2.f32 %v266_v22 }
 0x3f3   :  { %v329_v26 = vpop.eup %328 }
 0x3f4   :  { %v268_v28 = vmul.f32 0.6931472, %v329_v26 }
 0x3f6   :  { %v269_v30 = vadd.f32 %v268_v28, %v260_v29 }
 0x3f8   :  { %271 = vst.msk [vmem:[%s446_s6] sm:$0xff] %vm270_vm5, %v269_v30 }

</bundles_post_ra>
